<compile_context>
chip_gen: v6e
topology: v6e:2x2x1
jax: 0.10.0
libtpu: 0.0.40
codegen_flags: <defaults>
</compile_context>

<pallas_src>
import math

import jax
import jax.numpy as jnp
from jax import lax
from jax.experimental import pallas as pl
from jax.experimental.pallas import tpu as pltpu


def _q_tile(nq: int) -> int:
    """Pick a Q-tile size: full Nq when small, otherwise a divisor <= 256."""
    if nq <= 256:
        return nq
    for t in (256, 128, 64, 32, 16, 8):
        if nq % t == 0:
            return t
    return nq


def _make_mha_kernel(n_heads: int, d_head: int, d_token: int):
    scale = 1.0 / math.sqrt(d_head)
    D = d_token

    def mha_kernel(xq_ref, xkv_ref,
                   wqt_ref, bq_ref, wkvt_ref, bkv_ref, wot_ref, bo_ref,
                   out_ref, logits_ref, probs_ref,
                   attn_scratch):
        xq = xq_ref[...]       # (Tq, D)
        xkv = xkv_ref[...]     # (Nk, D)

        # Projections: weights are already transposed in the wrapper, and
        # W_k^T | W_v^T are fused into one (D, 2D) operand (one wide MXU pass).
        q = jnp.dot(xq, wqt_ref[...], preferred_element_type=jnp.float32) + bq_ref[...]
        kv = jnp.dot(xkv, wkvt_ref[...], preferred_element_type=jnp.float32) + bkv_ref[...]
        k = kv[:, :D]          # (Nk, D)
        v = kv[:, D:]          # (Nk, D)

        for h in range(n_heads):  # static unroll over heads
            lo = h * d_head
            hi = lo + d_head
            qh = q[:, lo:hi]      # (Tq, d_head)
            kh = k[:, lo:hi]      # (Nk, d_head)
            vh = v[:, lo:hi]      # (Nk, d_head)

            # Contract last dims directly (no explicit transpose of K).
            logits = lax.dot_general(
                qh, kh, (((1,), (1,)), ((), ())),
                preferred_element_type=jnp.float32) * scale          # (Tq, Nk)

            m = jnp.max(logits, axis=-1, keepdims=True)
            e = jnp.exp(logits - m)
            denom = jnp.sum(e, axis=-1, keepdims=True)
            probs = e * pl.reciprocal(denom, approx=False)

            logits_ref[h] = logits
            probs_ref[h] = probs

            # Accumulate head output into the (Tq, D) scratch (no concat).
            attn_scratch[:, lo:hi] = jnp.dot(
                probs, vh, preferred_element_type=jnp.float32)

        # Output projection (W_out exists because n_heads > 1).
        out_ref[...] = jnp.dot(attn_scratch[...], wot_ref[...],
                               preferred_element_type=jnp.float32) + bo_ref[...]

    return mha_kernel


def multihead_attention(x_q, x_kv, params, *, n_heads: int):
    """Pallas implementation of MultiheadAttention.forward (no key/value
    compression, dropout=0). Returns (out, {'attention_logits',
    'attention_probs'})."""
    B, Nq, D = x_q.shape
    _, Nk, _ = x_kv.shape
    assert D % n_heads == 0
    d_head = D // n_heads
    # TODO(synk): n_heads == 1 (W_out is None in the module) is not handled.
    assert n_heads > 1

    wq, bq = params["W_q"]
    wk, bk = params["W_k"]
    wv, bv = params["W_v"]
    wo, bo = params["W_out"]

    # One-time (XLA-side) weight preparation: transpose so the kernel never
    # transposes, and fuse K|V into one wide operand.
    wq_t = wq.T                                             # (D, D)
    wkv_t = jnp.concatenate([wk.T, wv.T], axis=1)           # (D, 2D)
    wo_t = wo.T                                             # (D, D)
    bq2 = bq.reshape(1, D)
    bkv2 = jnp.concatenate([bk, bv]).reshape(1, 2 * D)
    bo2 = bo.reshape(1, D)

    tq = _q_tile(Nq)
    n_q_tiles = Nq // tq

    kernel = _make_mha_kernel(n_heads, d_head, D)

    const2d = lambda shape: pl.BlockSpec(shape, lambda b, qi: (0, 0))

    out, logits, probs = pl.pallas_call(
        kernel,
        out_shape=(
            jax.ShapeDtypeStruct((B, Nq, D), jnp.float32),
            jax.ShapeDtypeStruct((B, n_heads, Nq, Nk), jnp.float32),
            jax.ShapeDtypeStruct((B, n_heads, Nq, Nk), jnp.float32),
        ),
        grid=(B, n_q_tiles),
        in_specs=[
            pl.BlockSpec((None, tq, D), lambda b, qi: (b, qi, 0)),   # x_q tile
            pl.BlockSpec((None, Nk, D), lambda b, qi: (b, 0, 0)),    # x_kv
            const2d((D, D)), const2d((1, D)),                        # W_q^T, b_q
            const2d((D, 2 * D)), const2d((1, 2 * D)),                # [W_k^T|W_v^T], [b_k|b_v]
            const2d((D, D)), const2d((1, D)),                        # W_out^T, b_out
        ],
        out_specs=(
            pl.BlockSpec((None, tq, D), lambda b, qi: (b, qi, 0)),
            pl.BlockSpec((None, n_heads, tq, Nk), lambda b, qi: (b, 0, qi, 0)),
            pl.BlockSpec((None, n_heads, tq, Nk), lambda b, qi: (b, 0, qi, 0)),
        ),
        scratch_shapes=[pltpu.VMEM((tq, D), jnp.float32)],
        compiler_params=pltpu.CompilerParams(
            dimension_semantics=("parallel", "parallel")),
    )(x_q, x_kv, wq_t, bq2, wkv_t, bkv2, wo_t, bo2)

    # Match PyTorch: attention tensors have shape (batch * n_heads, Nq, Nk).
    logits = logits.reshape(B * n_heads, Nq, Nk)
    probs = probs.reshape(B * n_heads, Nq, Nk)
    return out, {"attention_logits": logits, "attention_probs": probs}


def _xavier_uniform(key, shape, gain):
    fan_out, fan_in = shape
    bound = gain * math.sqrt(6.0 / (fan_in + fan_out))
    return jax.random.uniform(key, shape, jnp.float32, -bound, bound)


def init_params(key, d_token: int):
    """Deterministic init mirroring MultiheadAttention.__init__ with
    initialization='xavier', bias=True, n_heads>1 (so W_v is also xavier,
    and W_out exists). Biases are zero as in the module."""
    kq, kk, kv, ko = jax.random.split(key, 4)
    gain = 1.0 / math.sqrt(2.0)
    zeros = jnp.zeros((d_token,), jnp.float32)
    return {
        "W_q": (_xavier_uniform(kq, (d_token, d_token), gain), zeros),
        "W_k": (_xavier_uniform(kk, (d_token, d_token), gain), zeros),
        "W_v": (_xavier_uniform(kv, (d_token, d_token), gain), zeros),
        # W_out: any deterministic dense init is fine for a synthetic kernel.
        "W_out": (_xavier_uniform(ko, (d_token, d_token), 1.0), zeros),
    }


def _reference(x_q, x_kv, params, n_heads):
    """Pure-JAX reference replicating the PyTorch forward semantics."""
    B, Nq, D = x_q.shape
    d_head = D // n_heads
    lin = lambda x, wb: x @ wb[0].T + wb[1]
    q, k, v = lin(x_q, params["W_q"]), lin(x_kv, params["W_k"]), lin(x_kv, params["W_v"])

    def reshape(t):
        b, n, d = t.shape
        return t.reshape(b, n, n_heads, d // n_heads).transpose(0, 2, 1, 3)\
                .reshape(b * n_heads, n, d // n_heads)

    q, k, v = reshape(q), reshape(k), reshape(v)
    logits = jnp.einsum("bnd,bmd->bnm", q, k) / math.sqrt(d_head)
    probs = jax.nn.softmax(logits, axis=-1)
    x = jnp.einsum("bnm,bmd->bnd", probs, v)
    x = x.reshape(B, n_heads, Nq, d_head).transpose(0, 2, 1, 3).reshape(B, Nq, D)
    x = lin(x, params["W_out"])
    return x, logits, probs


if __name__ == "__main__":
    B, Nq, Nk, D, H = 2, 8, 8, 32, 4

    key = jax.random.PRNGKey(0)
    k_params, k_xq, k_xkv = jax.random.split(key, 3)
    params = init_params(k_params, D)
    x_q = jax.random.normal(k_xq, (B, Nq, D), jnp.float32)
    x_kv = jax.random.normal(k_xkv, (B, Nk, D), jnp.float32)

    out, aux = multihead_attention(x_q, x_kv, params, n_heads=H)
    jax.block_until_ready(out)
    jax.block_until_ready(aux["attention_probs"])

    # Correctness check against pure-JAX reference.
    ref_out, ref_logits, ref_probs = _reference(x_q, x_kv, params, H)
    assert jnp.allclose(out, ref_out, atol=1e-5), "output mismatch"
    assert jnp.allclose(aux["attention_logits"], ref_logits, atol=1e-5), "logits mismatch"
    assert jnp.allclose(aux["attention_probs"], ref_probs, atol=1e-5), "probs mismatch"

    print("KERNEL_OK")
</pallas_src>

<mosaic_0001>
module attributes {stable_mosaic.version = 11 : i64} {
  func.func @mha_kernel(%arg0: i32, %arg1: i32, %arg2: memref<1x8x32xf32, #tpu.memory_space<vmem>>, %arg3: memref<1x8x32xf32, #tpu.memory_space<vmem>>, %arg4: memref<32x32xf32, #tpu.memory_space<vmem>>, %arg5: memref<1x32xf32, #tpu.memory_space<vmem>>, %arg6: memref<32x64xf32, #tpu.memory_space<vmem>>, %arg7: memref<1x64xf32, #tpu.memory_space<vmem>>, %arg8: memref<32x32xf32, #tpu.memory_space<vmem>>, %arg9: memref<1x32xf32, #tpu.memory_space<vmem>>, %arg10: memref<1x8x32xf32, #tpu.memory_space<vmem>>, %arg11: memref<1x4x8x8xf32, #tpu.memory_space<vmem>>, %arg12: memref<1x4x8x8xf32, #tpu.memory_space<vmem>>, %arg13: memref<8x32xf32, #tpu.memory_space<vmem>>) attributes {dimension_semantics = [#tpu.dimension_semantics<parallel>, #tpu.dimension_semantics<parallel>], iteration_bounds = array<i64: 2, 1>, scalar_prefetch = 0 : i64, scratch_operands = 1 : i64, tpu.core_type = #tpu.core_type<tc>, window_params = [{transform_indices = @transform_0, window_bounds = array<i64: 1, 8, 32>}, {transform_indices = @transform_1, window_bounds = array<i64: 1, 8, 32>}, {pipeline_mode = #tpu.pipeline_mode<synchronous>, transform_indices = @transform_2, window_bounds = array<i64: 32, 32>}, {pipeline_mode = #tpu.pipeline_mode<synchronous>, transform_indices = @transform_3, window_bounds = array<i64: 1, 32>}, {pipeline_mode = #tpu.pipeline_mode<synchronous>, transform_indices = @transform_4, window_bounds = array<i64: 32, 64>}, {pipeline_mode = #tpu.pipeline_mode<synchronous>, transform_indices = @transform_5, window_bounds = array<i64: 1, 64>}, {pipeline_mode = #tpu.pipeline_mode<synchronous>, transform_indices = @transform_6, window_bounds = array<i64: 32, 32>}, {pipeline_mode = #tpu.pipeline_mode<synchronous>, transform_indices = @transform_7, window_bounds = array<i64: 1, 32>}, {transform_indices = @transform_8, window_bounds = array<i64: 1, 8, 32>}, {transform_indices = @transform_9, window_bounds = array<i64: 1, 4, 8, 8>}, {transform_indices = @transform_10, window_bounds = array<i64: 1, 4, 8, 8>}]} {
    %c0 = arith.constant 0 : index
    %c0_0 = arith.constant 0 : index
    %c0_1 = arith.constant 0 : index
    %0 = vector.load %arg2[%c0, %c0_0, %c0_1] : memref<1x8x32xf32, #tpu.memory_space<vmem>>, vector<1x8x32xf32>
    %1 = vector.shape_cast %0 : vector<1x8x32xf32> to vector<8x32xf32>
    %c0_2 = arith.constant 0 : index
    %c0_3 = arith.constant 0 : index
    %c0_4 = arith.constant 0 : index
    %2 = vector.load %arg3[%c0_2, %c0_3, %c0_4] : memref<1x8x32xf32, #tpu.memory_space<vmem>>, vector<1x8x32xf32>
    %3 = vector.shape_cast %2 : vector<1x8x32xf32> to vector<8x32xf32>
    %c0_5 = arith.constant 0 : index
    %c0_6 = arith.constant 0 : index
    %4 = vector.load %arg4[%c0_5, %c0_6] : memref<32x32xf32, #tpu.memory_space<vmem>>, vector<32x32xf32>
    %cst = arith.constant dense<0.000000e+00> : vector<8x32xf32>
    %5 = tpu.matmul %1, %4, %cst {dimension_numbers = #tpu.dot_dimension_numbers<[1], [0], [0], [1], [0, 0, 1, 1], [], []>} : vector<8x32xf32>, vector<32x32xf32>, vector<8x32xf32> -> vector<8x32xf32>
    %c0_7 = arith.constant 0 : index
    %c0_8 = arith.constant 0 : index
    %6 = vector.load %arg5[%c0_7, %c0_8] : memref<1x32xf32, #tpu.memory_space<vmem>>, vector<1x32xf32>
    %7 = vector.broadcast %6 : vector<1x32xf32> to vector<8x32xf32>
    %8 = arith.addf %5, %7 : vector<8x32xf32>
    %c0_9 = arith.constant 0 : index
    %c0_10 = arith.constant 0 : index
    %9 = vector.load %arg6[%c0_9, %c0_10] : memref<32x64xf32, #tpu.memory_space<vmem>>, vector<32x64xf32>
    %cst_11 = arith.constant dense<0.000000e+00> : vector<8x64xf32>
    %10 = tpu.matmul %3, %9, %cst_11 {dimension_numbers = #tpu.dot_dimension_numbers<[1], [0], [0], [1], [0, 0, 1, 1], [], []>} : vector<8x32xf32>, vector<32x64xf32>, vector<8x64xf32> -> vector<8x64xf32>
    %c0_12 = arith.constant 0 : index
    %c0_13 = arith.constant 0 : index
    %11 = vector.load %arg7[%c0_12, %c0_13] : memref<1x64xf32, #tpu.memory_space<vmem>>, vector<1x64xf32>
    %12 = vector.broadcast %11 : vector<1x64xf32> to vector<8x64xf32>
    %13 = arith.addf %10, %12 : vector<8x64xf32>
    %14 = vector.extract_strided_slice %13 {offsets = [0, 0], sizes = [8, 32], strides = [1, 1]} : vector<8x64xf32> to vector<8x32xf32>
    %15 = vector.extract_strided_slice %13 {offsets = [0, 32], sizes = [8, 32], strides = [1, 1]} : vector<8x64xf32> to vector<8x32xf32>
    %16 = vector.extract_strided_slice %8 {offsets = [0, 0], sizes = [8, 8], strides = [1, 1]} : vector<8x32xf32> to vector<8x8xf32>
    %17 = vector.extract_strided_slice %14 {offsets = [0, 0], sizes = [8, 8], strides = [1, 1]} : vector<8x32xf32> to vector<8x8xf32>
    %18 = vector.extract_strided_slice %15 {offsets = [0, 0], sizes = [8, 8], strides = [1, 1]} : vector<8x32xf32> to vector<8x8xf32>
    %cst_14 = arith.constant dense<0.000000e+00> : vector<8x8xf32>
    %19 = tpu.matmul %16, %17, %cst_14 {dimension_numbers = #tpu.dot_dimension_numbers<[1], [1], [0], [0], [0, 0, 1, 0], [], []>} : vector<8x8xf32>, vector<8x8xf32>, vector<8x8xf32> -> vector<8x8xf32>
    %cst_15 = arith.constant 0.353553385 : f32
    %20 = vector.broadcast %cst_15 : f32 to vector<8x8xf32>
    %21 = arith.mulf %19, %20 : vector<8x8xf32>
    %cst_16 = arith.constant dense<0xFF800000> : vector<8xf32>
    %22 = vector.multi_reduction <maximumf>, %21, %cst_16 [1] : vector<8x8xf32> to vector<8xf32>
    %23 = vector.shape_cast %22 : vector<8xf32> to vector<8x1xf32>
    %24 = vector.broadcast %23 : vector<8x1xf32> to vector<8x8xf32>
    %25 = arith.subf %21, %24 : vector<8x8xf32>
    %26 = math.exp %25 : vector<8x8xf32>
    %cst_17 = arith.constant dense<0.000000e+00> : vector<8xf32>
    %27 = vector.multi_reduction <add>, %26, %cst_17 [1] : vector<8x8xf32> to vector<8xf32>
    %28 = vector.shape_cast %27 : vector<8xf32> to vector<8x1xf32>
    %29 = tpu.reciprocal %28 : vector<8x1xf32> -> vector<8x1xf32>
    %30 = vector.broadcast %29 : vector<8x1xf32> to vector<8x8xf32>
    %31 = arith.mulf %26, %30 : vector<8x8xf32>
    %c0_18 = arith.constant 0 : index
    %c0_19 = arith.constant 0 : index
    %c0_20 = arith.constant 0 : index
    %c0_21 = arith.constant 0 : index
    %32 = vector.load %arg11[%c0_18, %c0_19, %c0_20, %c0_21] : memref<1x4x8x8xf32, #tpu.memory_space<vmem>>, vector<1x1x8x8xf32>
    %33 = vector.shape_cast %32 : vector<1x1x8x8xf32> to vector<8x8xf32>
    %34 = vector.shape_cast %21 : vector<8x8xf32> to vector<1x1x8x8xf32>
    tpu.vector_store %arg11[%c0_18, %c0_19, %c0_20, %c0_21], %34 {strides = array<i32>} : memref<1x4x8x8xf32, #tpu.memory_space<vmem>>, vector<1x1x8x8xf32>,
    %c0_22 = arith.constant 0 : index
    %c0_23 = arith.constant 0 : index
    %c0_24 = arith.constant 0 : index
    %c0_25 = arith.constant 0 : index
    %35 = vector.load %arg12[%c0_22, %c0_23, %c0_24, %c0_25] : memref<1x4x8x8xf32, #tpu.memory_space<vmem>>, vector<1x1x8x8xf32>
    %36 = vector.shape_cast %35 : vector<1x1x8x8xf32> to vector<8x8xf32>
    %37 = vector.shape_cast %31 : vector<8x8xf32> to vector<1x1x8x8xf32>
    tpu.vector_store %arg12[%c0_22, %c0_23, %c0_24, %c0_25], %37 {strides = array<i32>} : memref<1x4x8x8xf32, #tpu.memory_space<vmem>>, vector<1x1x8x8xf32>,
    %cst_26 = arith.constant dense<0.000000e+00> : vector<8x8xf32>
    %38 = tpu.matmul %31, %18, %cst_26 {dimension_numbers = #tpu.dot_dimension_numbers<[1], [0], [0], [1], [0, 0, 1, 1], [], []>} : vector<8x8xf32>, vector<8x8xf32>, vector<8x8xf32> -> vector<8x8xf32>
    %c0_27 = arith.constant 0 : index
    %c0_28 = arith.constant 0 : index
    %39 = vector.load %arg13[%c0_27, %c0_28] : memref<8x32xf32, #tpu.memory_space<vmem>>, vector<8x8xf32>
    tpu.vector_store %arg13[%c0_27, %c0_28], %38 {strides = array<i32>} : memref<8x32xf32, #tpu.memory_space<vmem>>, vector<8x8xf32>,
    %40 = vector.extract_strided_slice %8 {offsets = [0, 8], sizes = [8, 8], strides = [1, 1]} : vector<8x32xf32> to vector<8x8xf32>
    %41 = vector.extract_strided_slice %14 {offsets = [0, 8], sizes = [8, 8], strides = [1, 1]} : vector<8x32xf32> to vector<8x8xf32>
    %42 = vector.extract_strided_slice %15 {offsets = [0, 8], sizes = [8, 8], strides = [1, 1]} : vector<8x32xf32> to vector<8x8xf32>
    %cst_29 = arith.constant dense<0.000000e+00> : vector<8x8xf32>
    %43 = tpu.matmul %40, %41, %cst_29 {dimension_numbers = #tpu.dot_dimension_numbers<[1], [1], [0], [0], [0, 0, 1, 0], [], []>} : vector<8x8xf32>, vector<8x8xf32>, vector<8x8xf32> -> vector<8x8xf32>
    %cst_30 = arith.constant 0.353553385 : f32
    %44 = vector.broadcast %cst_30 : f32 to vector<8x8xf32>
    %45 = arith.mulf %43, %44 : vector<8x8xf32>
    %cst_31 = arith.constant dense<0xFF800000> : vector<8xf32>
    %46 = vector.multi_reduction <maximumf>, %45, %cst_31 [1] : vector<8x8xf32> to vector<8xf32>
    %47 = vector.shape_cast %46 : vector<8xf32> to vector<8x1xf32>
    %48 = vector.broadcast %47 : vector<8x1xf32> to vector<8x8xf32>
    %49 = arith.subf %45, %48 : vector<8x8xf32>
    %50 = math.exp %49 : vector<8x8xf32>
    %cst_32 = arith.constant dense<0.000000e+00> : vector<8xf32>
    %51 = vector.multi_reduction <add>, %50, %cst_32 [1] : vector<8x8xf32> to vector<8xf32>
    %52 = vector.shape_cast %51 : vector<8xf32> to vector<8x1xf32>
    %53 = tpu.reciprocal %52 : vector<8x1xf32> -> vector<8x1xf32>
    %54 = vector.broadcast %53 : vector<8x1xf32> to vector<8x8xf32>
    %55 = arith.mulf %50, %54 : vector<8x8xf32>
    %c0_33 = arith.constant 0 : index
    %c1 = arith.constant 1 : index
    %c0_34 = arith.constant 0 : index
    %c0_35 = arith.constant 0 : index
    %56 = vector.load %arg11[%c0_33, %c1, %c0_34, %c0_35] : memref<1x4x8x8xf32, #tpu.memory_space<vmem>>, vector<1x1x8x8xf32>
    %57 = vector.shape_cast %56 : vector<1x1x8x8xf32> to vector<8x8xf32>
    %58 = vector.shape_cast %45 : vector<8x8xf32> to vector<1x1x8x8xf32>
    tpu.vector_store %arg11[%c0_33, %c1, %c0_34, %c0_35], %58 {strides = array<i32>} : memref<1x4x8x8xf32, #tpu.memory_space<vmem>>, vector<1x1x8x8xf32>,
    %c0_36 = arith.constant 0 : index
    %c1_37 = arith.constant 1 : index
    %c0_38 = arith.constant 0 : index
    %c0_39 = arith.constant 0 : index
    %59 = vector.load %arg12[%c0_36, %c1_37, %c0_38, %c0_39] : memref<1x4x8x8xf32, #tpu.memory_space<vmem>>, vector<1x1x8x8xf32>
    %60 = vector.shape_cast %59 : vector<1x1x8x8xf32> to vector<8x8xf32>
    %61 = vector.shape_cast %55 : vector<8x8xf32> to vector<1x1x8x8xf32>
    tpu.vector_store %arg12[%c0_36, %c1_37, %c0_38, %c0_39], %61 {strides = array<i32>} : memref<1x4x8x8xf32, #tpu.memory_space<vmem>>, vector<1x1x8x8xf32>,
    %cst_40 = arith.constant dense<0.000000e+00> : vector<8x8xf32>
    %62 = tpu.matmul %55, %42, %cst_40 {dimension_numbers = #tpu.dot_dimension_numbers<[1], [0], [0], [1], [0, 0, 1, 1], [], []>} : vector<8x8xf32>, vector<8x8xf32>, vector<8x8xf32> -> vector<8x8xf32>
    %c0_41 = arith.constant 0 : index
    %c8 = arith.constant 8 : index
    %63 = vector.load %arg13[%c0_41, %c8] : memref<8x32xf32, #tpu.memory_space<vmem>>, vector<8x8xf32>
    tpu.vector_store %arg13[%c0_41, %c8], %62 {strides = array<i32>} : memref<8x32xf32, #tpu.memory_space<vmem>>, vector<8x8xf32>,
    %64 = vector.extract_strided_slice %8 {offsets = [0, 16], sizes = [8, 8], strides = [1, 1]} : vector<8x32xf32> to vector<8x8xf32>
    %65 = vector.extract_strided_slice %14 {offsets = [0, 16], sizes = [8, 8], strides = [1, 1]} : vector<8x32xf32> to vector<8x8xf32>
    %66 = vector.extract_strided_slice %15 {offsets = [0, 16], sizes = [8, 8], strides = [1, 1]} : vector<8x32xf32> to vector<8x8xf32>
    %cst_42 = arith.constant dense<0.000000e+00> : vector<8x8xf32>
    %67 = tpu.matmul %64, %65, %cst_42 {dimension_numbers = #tpu.dot_dimension_numbers<[1], [1], [0], [0], [0, 0, 1, 0], [], []>} : vector<8x8xf32>, vector<8x8xf32>, vector<8x8xf32> -> vector<8x8xf32>
    %cst_43 = arith.constant 0.353553385 : f32
    %68 = vector.broadcast %cst_43 : f32 to vector<8x8xf32>
    %69 = arith.mulf %67, %68 : vector<8x8xf32>
    %cst_44 = arith.constant dense<0xFF800000> : vector<8xf32>
    %70 = vector.multi_reduction <maximumf>, %69, %cst_44 [1] : vector<8x8xf32> to vector<8xf32>
    %71 = vector.shape_cast %70 : vector<8xf32> to vector<8x1xf32>
    %72 = vector.broadcast %71 : vector<8x1xf32> to vector<8x8xf32>
    %73 = arith.subf %69, %72 : vector<8x8xf32>
    %74 = math.exp %73 : vector<8x8xf32>
    %cst_45 = arith.constant dense<0.000000e+00> : vector<8xf32>
    %75 = vector.multi_reduction <add>, %74, %cst_45 [1] : vector<8x8xf32> to vector<8xf32>
    %76 = vector.shape_cast %75 : vector<8xf32> to vector<8x1xf32>
    %77 = tpu.reciprocal %76 : vector<8x1xf32> -> vector<8x1xf32>
    %78 = vector.broadcast %77 : vector<8x1xf32> to vector<8x8xf32>
    %79 = arith.mulf %74, %78 : vector<8x8xf32>
    %c0_46 = arith.constant 0 : index
    %c2 = arith.constant 2 : index
    %c0_47 = arith.constant 0 : index
    %c0_48 = arith.constant 0 : index
    %80 = vector.load %arg11[%c0_46, %c2, %c0_47, %c0_48] : memref<1x4x8x8xf32, #tpu.memory_space<vmem>>, vector<1x1x8x8xf32>
    %81 = vector.shape_cast %80 : vector<1x1x8x8xf32> to vector<8x8xf32>
    %82 = vector.shape_cast %69 : vector<8x8xf32> to vector<1x1x8x8xf32>
    tpu.vector_store %arg11[%c0_46, %c2, %c0_47, %c0_48], %82 {strides = array<i32>} : memref<1x4x8x8xf32, #tpu.memory_space<vmem>>, vector<1x1x8x8xf32>,
    %c0_49 = arith.constant 0 : index
    %c2_50 = arith.constant 2 : index
    %c0_51 = arith.constant 0 : index
    %c0_52 = arith.constant 0 : index
    %83 = vector.load %arg12[%c0_49, %c2_50, %c0_51, %c0_52] : memref<1x4x8x8xf32, #tpu.memory_space<vmem>>, vector<1x1x8x8xf32>
    %84 = vector.shape_cast %83 : vector<1x1x8x8xf32> to vector<8x8xf32>
    %85 = vector.shape_cast %79 : vector<8x8xf32> to vector<1x1x8x8xf32>
    tpu.vector_store %arg12[%c0_49, %c2_50, %c0_51, %c0_52], %85 {strides = array<i32>} : memref<1x4x8x8xf32, #tpu.memory_space<vmem>>, vector<1x1x8x8xf32>,
    %cst_53 = arith.constant dense<0.000000e+00> : vector<8x8xf32>
    %86 = tpu.matmul %79, %66, %cst_53 {dimension_numbers = #tpu.dot_dimension_numbers<[1], [0], [0], [1], [0, 0, 1, 1], [], []>} : vector<8x8xf32>, vector<8x8xf32>, vector<8x8xf32> -> vector<8x8xf32>
    %c0_54 = arith.constant 0 : index
    %c16 = arith.constant 16 : index
    %87 = vector.load %arg13[%c0_54, %c16] : memref<8x32xf32, #tpu.memory_space<vmem>>, vector<8x8xf32>
    tpu.vector_store %arg13[%c0_54, %c16], %86 {strides = array<i32>} : memref<8x32xf32, #tpu.memory_space<vmem>>, vector<8x8xf32>,
    %88 = vector.extract_strided_slice %8 {offsets = [0, 24], sizes = [8, 8], strides = [1, 1]} : vector<8x32xf32> to vector<8x8xf32>
    %89 = vector.extract_strided_slice %14 {offsets = [0, 24], sizes = [8, 8], strides = [1, 1]} : vector<8x32xf32> to vector<8x8xf32>
    %90 = vector.extract_strided_slice %15 {offsets = [0, 24], sizes = [8, 8], strides = [1, 1]} : vector<8x32xf32> to vector<8x8xf32>
    %cst_55 = arith.constant dense<0.000000e+00> : vector<8x8xf32>
    %91 = tpu.matmul %88, %89, %cst_55 {dimension_numbers = #tpu.dot_dimension_numbers<[1], [1], [0], [0], [0, 0, 1, 0], [], []>} : vector<8x8xf32>, vector<8x8xf32>, vector<8x8xf32> -> vector<8x8xf32>
    %cst_56 = arith.constant 0.353553385 : f32
    %92 = vector.broadcast %cst_56 : f32 to vector<8x8xf32>
    %93 = arith.mulf %91, %92 : vector<8x8xf32>
    %cst_57 = arith.constant dense<0xFF800000> : vector<8xf32>
    %94 = vector.multi_reduction <maximumf>, %93, %cst_57 [1] : vector<8x8xf32> to vector<8xf32>
    %95 = vector.shape_cast %94 : vector<8xf32> to vector<8x1xf32>
    %96 = vector.broadcast %95 : vector<8x1xf32> to vector<8x8xf32>
    %97 = arith.subf %93, %96 : vector<8x8xf32>
    %98 = math.exp %97 : vector<8x8xf32>
    %cst_58 = arith.constant dense<0.000000e+00> : vector<8xf32>
    %99 = vector.multi_reduction <add>, %98, %cst_58 [1] : vector<8x8xf32> to vector<8xf32>
    %100 = vector.shape_cast %99 : vector<8xf32> to vector<8x1xf32>
    %101 = tpu.reciprocal %100 : vector<8x1xf32> -> vector<8x1xf32>
    %102 = vector.broadcast %101 : vector<8x1xf32> to vector<8x8xf32>
    %103 = arith.mulf %98, %102 : vector<8x8xf32>
    %c0_59 = arith.constant 0 : index
    %c3 = arith.constant 3 : index
    %c0_60 = arith.constant 0 : index
    %c0_61 = arith.constant 0 : index
    %104 = vector.load %arg11[%c0_59, %c3, %c0_60, %c0_61] : memref<1x4x8x8xf32, #tpu.memory_space<vmem>>, vector<1x1x8x8xf32>
    %105 = vector.shape_cast %104 : vector<1x1x8x8xf32> to vector<8x8xf32>
    %106 = vector.shape_cast %93 : vector<8x8xf32> to vector<1x1x8x8xf32>
    tpu.vector_store %arg11[%c0_59, %c3, %c0_60, %c0_61], %106 {strides = array<i32>} : memref<1x4x8x8xf32, #tpu.memory_space<vmem>>, vector<1x1x8x8xf32>,
    %c0_62 = arith.constant 0 : index
    %c3_63 = arith.constant 3 : index
    %c0_64 = arith.constant 0 : index
    %c0_65 = arith.constant 0 : index
    %107 = vector.load %arg12[%c0_62, %c3_63, %c0_64, %c0_65] : memref<1x4x8x8xf32, #tpu.memory_space<vmem>>, vector<1x1x8x8xf32>
    %108 = vector.shape_cast %107 : vector<1x1x8x8xf32> to vector<8x8xf32>
    %109 = vector.shape_cast %103 : vector<8x8xf32> to vector<1x1x8x8xf32>
    tpu.vector_store %arg12[%c0_62, %c3_63, %c0_64, %c0_65], %109 {strides = array<i32>} : memref<1x4x8x8xf32, #tpu.memory_space<vmem>>, vector<1x1x8x8xf32>,
    %cst_66 = arith.constant dense<0.000000e+00> : vector<8x8xf32>
    %110 = tpu.matmul %103, %90, %cst_66 {dimension_numbers = #tpu.dot_dimension_numbers<[1], [0], [0], [1], [0, 0, 1, 1], [], []>} : vector<8x8xf32>, vector<8x8xf32>, vector<8x8xf32> -> vector<8x8xf32>
    %c0_67 = arith.constant 0 : index
    %c24 = arith.constant 24 : index
    %111 = vector.load %arg13[%c0_67, %c24] : memref<8x32xf32, #tpu.memory_space<vmem>>, vector<8x8xf32>
    tpu.vector_store %arg13[%c0_67, %c24], %110 {strides = array<i32>} : memref<8x32xf32, #tpu.memory_space<vmem>>, vector<8x8xf32>,
    %c0_68 = arith.constant 0 : index
    %c0_69 = arith.constant 0 : index
    %112 = vector.load %arg13[%c0_68, %c0_69] : memref<8x32xf32, #tpu.memory_space<vmem>>, vector<8x32xf32>
    %c0_70 = arith.constant 0 : index
    %c0_71 = arith.constant 0 : index
    %113 = vector.load %arg8[%c0_70, %c0_71] : memref<32x32xf32, #tpu.memory_space<vmem>>, vector<32x32xf32>
    %cst_72 = arith.constant dense<0.000000e+00> : vector<8x32xf32>
    %114 = tpu.matmul %112, %113, %cst_72 {dimension_numbers = #tpu.dot_dimension_numbers<[1], [0], [0], [1], [0, 0, 1, 1], [], []>} : vector<8x32xf32>, vector<32x32xf32>, vector<8x32xf32> -> vector<8x32xf32>
    %c0_73 = arith.constant 0 : index
    %c0_74 = arith.constant 0 : index
    %115 = vector.load %arg9[%c0_73, %c0_74] : memref<1x32xf32, #tpu.memory_space<vmem>>, vector<1x32xf32>
    %116 = vector.broadcast %115 : vector<1x32xf32> to vector<8x32xf32>
    %117 = arith.addf %114, %116 : vector<8x32xf32>
    %c0_75 = arith.constant 0 : index
    %c0_76 = arith.constant 0 : index
    %c0_77 = arith.constant 0 : index
    %118 = vector.load %arg10[%c0_75, %c0_76, %c0_77] : memref<1x8x32xf32, #tpu.memory_space<vmem>>, vector<1x8x32xf32>
    %119 = vector.shape_cast %118 : vector<1x8x32xf32> to vector<8x32xf32>
    %120 = vector.shape_cast %117 : vector<8x32xf32> to vector<1x8x32xf32>
    tpu.vector_store %arg10[%c0_75, %c0_76, %c0_77], %120 {strides = array<i32>} : memref<1x8x32xf32, #tpu.memory_space<vmem>>, vector<1x8x32xf32>,
    return
  }
  func.func @transform_0(%arg0: i32, %arg1: i32) -> (i32, i32, i32) {
    %c0_i32 = arith.constant 0 : i32
    %c0_i32_0 = arith.constant 0 : i32
    return %arg0, %arg1, %c0_i32 : i32, i32, i32
  }
  func.func @transform_1(%arg0: i32, %arg1: i32) -> (i32, i32, i32) {
    %c0_i32 = arith.constant 0 : i32
    %c0_i32_0 = arith.constant 0 : i32
    %c0_i32_1 = arith.constant 0 : i32
    return %arg0, %c0_i32, %c0_i32_0 : i32, i32, i32
  }
  func.func @transform_2(%arg0: i32, %arg1: i32) -> (i32, i32) {
    %c0_i32 = arith.constant 0 : i32
    %c0_i32_0 = arith.constant 0 : i32
    %c0_i32_1 = arith.constant 0 : i32
    return %c0_i32, %c0_i32_0 : i32, i32
  }
  func.func @transform_3(%arg0: i32, %arg1: i32) -> (i32, i32) {
    %c0_i32 = arith.constant 0 : i32
    %c0_i32_0 = arith.constant 0 : i32
    %c0_i32_1 = arith.constant 0 : i32
    return %c0_i32, %c0_i32_0 : i32, i32
  }
  func.func @transform_4(%arg0: i32, %arg1: i32) -> (i32, i32) {
    %c0_i32 = arith.constant 0 : i32
    %c0_i32_0 = arith.constant 0 : i32
    %c0_i32_1 = arith.constant 0 : i32
    return %c0_i32, %c0_i32_0 : i32, i32
  }
  func.func @transform_5(%arg0: i32, %arg1: i32) -> (i32, i32) {
    %c0_i32 = arith.constant 0 : i32
    %c0_i32_0 = arith.constant 0 : i32
    %c0_i32_1 = arith.constant 0 : i32
    return %c0_i32, %c0_i32_0 : i32, i32
  }
  func.func @transform_6(%arg0: i32, %arg1: i32) -> (i32, i32) {
    %c0_i32 = arith.constant 0 : i32
    %c0_i32_0 = arith.constant 0 : i32
    %c0_i32_1 = arith.constant 0 : i32
    return %c0_i32, %c0_i32_0 : i32, i32
  }
  func.func @transform_7(%arg0: i32, %arg1: i32) -> (i32, i32) {
    %c0_i32 = arith.constant 0 : i32
    %c0_i32_0 = arith.constant 0 : i32
    %c0_i32_1 = arith.constant 0 : i32
    return %c0_i32, %c0_i32_0 : i32, i32
  }
  func.func @transform_8(%arg0: i32, %arg1: i32) -> (i32, i32, i32) {
    %c0_i32 = arith.constant 0 : i32
    %c0_i32_0 = arith.constant 0 : i32
    return %arg0, %arg1, %c0_i32 : i32, i32, i32
  }
  func.func @transform_9(%arg0: i32, %arg1: i32) -> (i32, i32, i32, i32) {
    %c0_i32 = arith.constant 0 : i32
    %c0_i32_0 = arith.constant 0 : i32
    %c0_i32_1 = arith.constant 0 : i32
    return %arg0, %c0_i32, %arg1, %c0_i32_0 : i32, i32, i32, i32
  }
  func.func @transform_10(%arg0: i32, %arg1: i32) -> (i32, i32, i32, i32) {
    %c0_i32 = arith.constant 0 : i32
    %c0_i32_0 = arith.constant 0 : i32
    %c0_i32_1 = arith.constant 0 : i32
    return %arg0, %c0_i32, %arg1, %c0_i32_0 : i32, i32, i32, i32
  }
}

</mosaic_0001>

<bundles_post_ra>
// kernel: tpu_custom_call.1
= control target key start
LH: loop header
LB: loop body
LE: loop exit
PB: predicated region body
PF: predicated region fallthrough
CT: control target
= control target key end

     0   :  { %s2767_s0 = inlined_call_operand.hbm [shape: f32[2,8,32], index: 0, kind: input, shape index: {}]   ;;  %s2768_s1 = inlined_call_operand.hbm [shape: f32[2,8,32], index: 1, kind: input, shape index: {}]   ;;  %s2769_s2 = inlined_call_operand.hbm [shape: f32[32,32], index: 2, kind: input, shape index: {}]   ;;  %s2770_s3 = inlined_call_operand.vmem [shape: f32[1,32], index: 3, kind: input, shape index: {}]   ;;  %s2771_s4 = inlined_call_operand.hbm [shape: f32[32,64], index: 4, kind: input, shape index: {}]   ;;  %s2772_s5 = inlined_call_operand.vmem [shape: f32[1,64], index: 5, kind: input, shape index: {}]   ;;  %s2773_s6 = inlined_call_operand.hbm [shape: f32[32,32], index: 6, kind: input, shape index: {}]   ;;  %s2774_s7 = inlined_call_operand.vmem [shape: f32[1,32], index: 7, kind: input, shape index: {}]   ;;  %s2775_s8 = inlined_call_operand.hbm [shape: f32[2,8,32], index: 8, kind: output, shape index: {0}]   ;;  %s2776_s9 = inlined_call_operand.hbm [shape: f32[2,4,8,8], index: 9, kind: output, shape index: {1}]   ;;  %s2777_s10 = inlined_call_operand.hbm [shape: f32[2,4,8,8], index: 10, kind: output, shape index: {2}]  }
   0x1   :  { %2785 = sst [smem:[#allocation25_spill]] %s2767_s0 }
   0x2   :  { %2786 = sst [smem:[#allocation26_spill]] %s2769_s2 }
   0x3   :  { %2787 = sst [smem:[#allocation27_spill]] %s2771_s4 }
   0x4   :  { %2788 = sst [smem:[#allocation28_spill]] %s2773_s6 }
   0x5   :  { %2789 = sst [smem:[#allocation29_spill]] %s2775_s8 }
   0x6   :  { %16 = vsyncpa [#allocation4], 0 }
   0x7   :  { %18 = vsyncpa [#allocation4 + $0x1], 0 }
   0x8   :  { %19 = vsyncpa [#allocation7], 0 }
   0x9   :  { %21 = vsyncpa [#allocation7 + $0x1], 0 }
   0xa   :  { %22 = vsyncpa [#allocation10], 0 }
   0xb   :  { %23 = vsyncpa [#allocation5], 0 }
   0xc   :  { %25 = vsyncpa [#allocation5 + $0x1], 0 }
   0xd   :  { %26 = vsyncpa [#allocation14], 0 }
   0xe   :  { %28 = vsyncpa [#allocation14 + $0x1], 0  ;;  %s2363_s13 = smov 0   ;;  %s2365_s14 = smov 0  }
   0xf   :  { %s2367_s15 = smov 0   ;;  %s2369_s16 = smov 0  }
  0x10   :  { %s2371_s17 = smov 0   ;;  %s2373_s18 = smov 0  }
  0x11 LB: > { %2790 = sst [smem:[#allocation22_spill]] %s2263_s13  ;;  %s2394_s19 = sadd.s32 4294967295, %s2283_s18   ;;  %s2283_s18 = sphi %s2373_s18, %s34_s18   ;;  %s2279_s17 = sphi %s2371_s17, %s2820_s17   ;;  %s2275_s16 = sphi %s2369_s16, %s2819_s16   ;;  %s2271_s15 = sphi %s2367_s15, %s2818_s15   ;;  %s2267_s14 = sphi %s2365_s14, %s2817_s14   ;;  %s2263_s13 = sphi %s2363_s13, %s2816_s13  }
  0x12   : > { %s2778_s20 = sadd.s32 4294967294, %s2283_s18   ;;  %p68_p0 = scmp.ne.s32.totalorder %s2267_s14, %s2263_s13 }
  0x13   : > { %p2779_p1 = scmp.eq.s32.totalorder %s2394_s19, 0  ;;  %p252_p3 = scmp.eq.s32.totalorder %s2778_s20, 1 }
  0x14   : > { %p1704_p5 = scmp.ge.s32.totalorder %s2283_s18, 1  ;;  %p315_p7 = scmp.lt.s32.totalorder %s2283_s18, 3 }
  0x15   : > { %p2405_p4 = por %p2779_p1, %p68_p0  ;;  %p2410_p6 = por %p252_p3, %p68_p0 }
  0x16   : > { %p2415_p8 = pnand %p1704_p5, %p315_p7  ;;  %s2285_s24 = smov [#allocation8]  }
  0x17   : > { %s2791_s21 = scalar_select %p2405_p4, 1, 0 }
  0x18   : > { %s2792_s22 = scalar_select %p2410_p6, 1, 0 }
  0x19   : > { %s327_s25 = sshll.u32 %s2285_s24, 4  ;;  %p1884_p9 = pneg %p2415_p8  ;;  %s328_s25 = int_to_ptr.vmem [resolvable:$true] %s327_s25 }
  0x1a   : > { %2793 = sst [smem:[#allocation23_spill]] %s2792_s22  ;;  %s2286_s27 = smov [#allocation9]  }
  0x1b   : > { %p2424_p11 = pnand %p1884_p9, %p2779_p1  ;;  %s343_s28 = sshll.u32 %s2286_s27, 4  ;;  %s344_s28 = int_to_ptr.vmem [resolvable:$true] %s343_s28 }
  0x1c   : > { %s2287_s29 = smov [#allocation11]   ;;  %s2012_s11 = scalar_lea.vmem %s328_s25, 512 }
  0x1d   : > { %s359_s30 = sshll.u32 %s2287_s29, 4  ;;  %p2003_p12 = pneg %p2424_p11  ;;  %s360_s30 = int_to_ptr.vmem [resolvable:$true] %s359_s30 }
  0x1e   : > { %p2013_p13 = scmp.ne.s32.totalorder %s328_s25, %s2012_s11  ;;  %p2020_p5 = scmp.lt.s32.totalorder %s328_s25, %s328_s25 }
  0x1f   : > { %p2021_p7 = scmp.lt.s32.totalorder %s2012_s11, %s2012_s11 }
  0x20   : > { %p2015_p0 = pnand %p2013_p13, %p2003_p12 }
  0x21   : > { %p2022_p9 = por %p2021_p7, %p2020_p5 }
  0x22   : > { %p2016_p3 = pneg %p2015_p0 }
  0x24   : > { %p2023_p10 = pnand %p2022_p9, %p2016_p3 }
  0x26   : > { %2026 = shalt.err (!%p2023_p10)
}
  0x27   : > { %s2288_s12 = smov 128   ;;  %s2289_s24 = smov 8  }
  0x28   : > { %s2796_s2 = sld [smem:[#allocation26_spill]]  ;;  %s2038_s20 = scalar_lea.vmem %s344_s28, 512 }
  0x29   : > { %p2039_p1 = scmp.ne.s32.totalorder %s344_s28, %s2038_s20  ;;  %p2046_p2 = scmp.lt.s32.totalorder %s344_s28, %s344_s28 }
  0x2a   : > { %p2047_p6 = scmp.lt.s32.totalorder %s2038_s20, %s2038_s20 }
  0x2b   : > { %p2041_p13 = pnand %p2039_p1, %p2003_p12 }
  0x2c   : > { %p2048_p5 = por %p2047_p6, %p2046_p2 }
  0x2d   : > { %p2042_p0 = pneg %p2041_p13 }
  0x2e   : > { %1887 = dma.hbm_to_vmem [thread:$0]  (!%p2424_p11), %s2796_s2, 512, %s328_s25, [#allocation7], %s2288_s12, %s2288_s12, %s2289_s24  }
  0x2f   : > { %p2049_p3 = pnand %p2048_p5, %p2042_p0 }
  0x31   : > { %2052 = shalt.err (!%p2049_p3)
}
  0x32   : > { %s2797_s4 = sld [smem:[#allocation27_spill]]  ;;  %s2064_s25 = scalar_lea.vmem %s360_s30, 512 }
  0x33   : > { %p2065_p10 = scmp.ne.s32.totalorder %s360_s30, %s2064_s25  ;;  %p2072_p9 = scmp.lt.s32.totalorder %s360_s30, %s360_s30 }
  0x34   : > { %p2073_p13 = scmp.lt.s32.totalorder %s2064_s25, %s2064_s25 }
  0x35   : > { %p2067_p7 = pnand %p2065_p10, %p2003_p12 }
  0x36   : > { %p2074_p4 = por %p2073_p13, %p2072_p9 }
  0x37   : > { %p2068_p1 = pneg %p2067_p7 }
  0x38   : > { %1890 = dma.hbm_to_vmem [thread:$0]  (!%p2424_p11), %s2797_s4, 512, %s344_s28, [#allocation10], %s2288_s12, %s2288_s12, %s2289_s24  }
  0x39   : > { %p2075_p2 = pnand %p2074_p4, %p2068_p1 }
  0x3b   : > { %2078 = shalt.err (!%p2075_p2)
}
  0x3c   : > { %s2798_s6 = sld [smem:[#allocation28_spill]]  ;;  %s55_s22 = sadd.s32 1, %s2271_s15 }
  0x3d   : > { %s46_s28 = sadd.s32 1, %s2279_s17  ;;  %p62_p4 = scmp.ne.s32.totalorder %s2271_s15, %s2267_s14 }
  0x3e   : > { %p48_p6 = scmp.ge.s32.totalorder %s46_s28, 2  ;;  %p63_p12 = scmp.eq.s32.totalorder %s2283_s18, 0 }
  0x3f   : > { %p2799_p0 = scmp.eq.s32.totalorder %s2394_s19, 1  ;;  %p1914_p3 = scmp.lt.s32.totalorder %s2283_s18, 2 }
  0x40   : > { %s2822_s28 = smov (%p48_p6, %s46_s28), 0  ;;  %p64_p10 = por %p63_p12, %p62_p4 }
  0x41   : > { %p2461_p5 = por %p2799_p0, %p62_p4  ;;  %2801 = sst [smem:[#allocation24_spill]] %s2822_s28 }
  0x42   : > { %1893 = dma.hbm_to_vmem [thread:$0]  (!%p2424_p11), %s2798_s6, 512, %s360_s30, [#allocation10], %s2288_s12, %s2288_s12, %s2289_s24  }
  0x43   : > { %s376_s29 = sand.u32 1, %s2271_s15   ;;  %s50_s11 = ssub.s32 %s2279_s17, %s2822_s28 }
  0x44   : > { %p53_p11 = scmp.eq.s32.totalorder %s50_s11, 0  ;;  %s1709_s30 = sshll.u32 %s376_s29, 3 }
  0x45   : > { %s1710_s12 = sshll.u32 %s2279_s17, 7  ;;  %s2802_s0 = sld [smem:[#allocation25_spill]] }
  0x46   : > { %s2473_s24 = scalar_select %p53_p11, %s2271_s15, %s55_s22  }
  0x47   : > { %s380_s2 = scalar_lea.vmem [#allocation3], %s1709_s30  ;;  %p2480_p7 = pnand %p1914_p3, %p64_p10 }
  0x48   : > { %s388_s4 = sshll.u32 %s380_s2, 4  ;;  %s2487_s11 = scalar_lea.hbm %s2768_s1, %s1710_s12  ;;  %s389_s4 = int_to_ptr.vmem [resolvable:$true] %s388_s4 }
  0x49   : > { %s395_s22 = sand.u32 1, %s2283_s18   ;;  %s377_s28 = scalar_lea.sflag [#allocation4], %s376_s29 }
  0x4a   : > { %p2081_p1 = pneg %p2480_p7  ;;  %s2092_s25 = scalar_lea.vmem %s389_s4, 128 }
  0x4b   : > { %s386_s27 = scalar_lea.hbm %s2802_s0, %s1710_s12  ;;  %p2093_p9 = scmp.ne.s32.totalorder %s389_s4, %s2092_s25 }
  0x4c   : > { %s2290_s2 = smov [#allocation3]  }
  0x4d   : > { %p2095_p13 = pnand %p2093_p9, %p2081_p1  ;;  %s2097_s20 = sshll.u32 %s2290_s2, 4  ;;  %s2098_s20 = int_to_ptr.vmem [resolvable:$false] %s2097_s20 }
  0x4e   : > { %s2099_s0 = scalar_lea.vmem %s2098_s20, 256  ;;  %p2100_p4 = scmp.lt.s32.totalorder %s389_s4, %s2098_s20 }
  0x4f   : > { %p2096_p2 = pneg %p2095_p13  ;;  %p2101_p6 = scmp.lt.s32.totalorder %s2099_s0, %s2092_s25 }
  0x51   : > { %p2102_p12 = por %p2101_p6, %p2100_p4 }
  0x53   : > { %p2103_p0 = pnand %p2102_p12, %p2096_p2 }
  0x55   : > { %2106 = shalt.err (!%p2103_p0)
}
  0x56   : > { %1897 = dma.hbm_to_vmem [thread:$0]  (!%p2480_p7), %s386_s27, 128, %s389_s4, %s377_s28  }
  0x57   : > { %s399_s8 = scalar_lea.vmem [#allocation6], %s1709_s30  ;;  %s396_s29 = scalar_lea.sflag [#allocation7], %s395_s22 }
  0x58   : > { %s406_s13 = sshll.u32 %s399_s8, 4  ;;  %s2291_s2 = smov [#allocation6]   ;;  %s407_s13 = int_to_ptr.vmem [resolvable:$true] %s406_s13 }
  0x59   : > { %s2120_s12 = scalar_lea.vmem %s407_s13, 128  ;;  %s2125_s20 = sshll.u32 %s2291_s2, 4  ;;  %s2126_s20 = int_to_ptr.vmem [resolvable:$false] %s2125_s20 }
  0x5a   : > { %p2121_p3 = scmp.ne.s32.totalorder %s407_s13, %s2120_s12  ;;  %s2127_s0 = scalar_lea.vmem %s2126_s20, 256 }
  0x5b   : > { %p2128_p9 = scmp.lt.s32.totalorder %s407_s13, %s2126_s20  ;;  %p2129_p13 = scmp.lt.s32.totalorder %s2127_s0, %s2120_s12 }
  0x5c   : > { %p2123_p10 = pnand %p2121_p3, %p2081_p1 }
  0x5d   : > { %p2130_p2 = por %p2129_p13, %p2128_p9 }
  0x5e   : > { %p2124_p11 = pneg %p2123_p10 }
  0x60   : > { %p2131_p4 = pnand %p2130_p2, %p2124_p11 }
  0x62   : > { %2134 = shalt.err (!%p2131_p4)
}
  0x63   : > { %1900 = dma.hbm_to_vmem [thread:$0]  (!%p2480_p7), %s2487_s11, 128, %s407_s13, %s396_s29  }
  0x64   : > { %415 = sbr.rel (%p2415_p8) target bundleno = 1480 (0x5c8), region = 52  ;;  %s2506_s4 = sand.u32 (!%p2415_p8), 1, %s2267_s14  }
  0x65   : > { %s2509_s28 = sshll.u32 (!%p2415_p8), %s2506_s4, 3  ;;  %s418_s30 = scalar_lea.sflag (!%p2415_p8), [#allocation4], %s2506_s4 }
  0x66   : > { %s421_s27 = scalar_lea.vmem (!%p2415_p8), [#allocation3], %s2509_s28  ;;  %p2804_p1 = scmp.ne.s32.totalorder (!%p2415_p8), %s2791_s21, 0 }
  0x69   : > { %2238 = dma.done.wait (%p2804_p1), %s418_s30, 128  }
  0x6a   : > { %2240 = vsyncadd (%p2804_p1), %s418_s30, 4294967168  ;;  %s426_s6 = sand.u32 1, %s2394_s19   ;;  %s430_s11 = scalar_lea.vmem [#allocation6], %s2509_s28 }
  0x6b   : > { %s427_s23 = scalar_lea.sflag [#allocation7], %s426_s6 }
  0x6c   : > { %2242 = dma.done.wait (%p2804_p1), %s427_s23, 128  }
  0x6d   : > { %2244 = vsyncadd (%p2804_p1), %s427_s23, 4294967168  ;;  %p2805_p8 = scmp.eq.s32.totalorder %s2394_s19, 0 }
  0x6f   : > { %2246 = dma.done.wait (%p2805_p8), [#allocation7], 512   ;;  %p2806_p7 = pmov %p2805_p8 }
  0x71   : > { %2248 = vsyncadd (%p2806_p7), [#allocation7], 4294966784  ;;  %p2807_p6 = pmov %p2806_p7 }
  0x73   : > { %2250 = dma.done.wait (%p2807_p6), [#allocation10], 1024   ;;  %p2808_p12 = pmov %p2807_p6 }
  0x74   : > { %v2292_v0 = vmov 0.0   ;;  %vm2293_vm0 = vmmov 0   ;;  %v584_v1 = vld [vmem:[#allocation9 + $0x18] sm:$0xff]  ;;  %v583_v3 = vld [vmem:[#allocation9 + $0x10] sm:$0xff]  ;;  %v582_v5 = vld [vmem:[#allocation9 + $0x8] sm:$0xff]  ;;  %vm507_vm1 = vcmask 261120  }
  0x75   : > { %2252 = vsyncadd (%p2808_p12), [#allocation10], 4294966272  ;;  %1800 = vmatprep.subr.mxu1 %v2292_v0  ;;  %1789 = vmatprep.subr.mxu0 %v2292_v0  ;;  %v499_v2 = vld [vmem:[#allocation8 + $0x18] sm:$0xff]  ;;  %v498_v4 = vld [vmem:[#allocation8 + $0x10] sm:$0xff]  ;;  %vm665_vm2 = vcmask 64512   ;;  %s2294_s13 = smov 112  }
  0x76   : > { %1808 = vmatprep.mubr.msk.f32.mxu1 %vm2293_vm0, %v2292_v0  ;;  %1797 = vmatprep.mubr.msk.f32.mxu0 %vm2293_vm0, %v2292_v0  ;;  %v497_v6 = vld [vmem:[#allocation8 + $0x8] sm:$0xff]  ;;  %v581_v7 = vld [vmem:[#allocation9] sm:$0xff]  ;;  %v495_v9 = vld [vmem:[%s430_s11] sm:$0xff]  ;;  %s2295_s29 = smov 120   ;;  %s2296_s12 = smov 104   ;;  %vm1007_vm3 = vcmask 130112  }
  0x77   : > { %1801 = vmatpush3.msra.mxu1 %v584_v1  ;;  %1790 = vmatpush3.msra.mxu0 %v499_v2  ;;  %v496_v8 = vld [vmem:[#allocation8] sm:$0xff]  ;;  %v1724_v11 = vld [vmem:[%s2772_s5] ss:$0 sm:$0xff]  ;;  %s1720_s2 = sshll.u32 %s2506_s4, 5  ;;  %s2297_s0 = smov 96   ;;  %vm1183_vm4 = vcmask 195712  }
  0x78   : > { %1802 = vmatprep.subr.mxu1 %v2292_v0  ;;  %1791 = vmatprep.subr.mxu0 %v2292_v0  ;;  %v494_v10 = vld [vmem:[%s421_s27] sm:$0xff]  ;;  %v1722_v13 = vld [vmem:[%s2770_s3] ss:$0 sm:$0xff]  ;;  %s2592_s20 = scalar_lea.vmem [#allocation13], %s1720_s2  ;;  %s2298_s30 = smov 80   ;;  %vm1359_vm5 = vcmask 261312  }
  0x79   : > { %1803 = vmatpush3.msra.mxu1 %v583_v3  ;;  %1792 = vmatpush3.msra.mxu0 %v498_v4  ;;  %s2299_s27 = smov 72   ;;  %s2300_s23 = smov 88  }
  0x7a   : > { %1804 = vmatprep.subr.mxu1 %v2292_v0  ;;  %1793 = vmatprep.subr.mxu0 %v2292_v0  ;;  %s2617_s11 = scalar_lea.vmem [#allocation15], %s1720_s2  ;;  %s2301_s21 = smov 8  }
  0x7b   : > { %1805 = vmatpush3.msra.mxu1 %v582_v5  ;;  %1794 = vmatpush3.msra.mxu0 %v497_v6  ;;  %s2302_s22 = smov 16   ;;  %s2303_s25 = smov 24  }
  0x7c   : > { %1806 = vmatprep.subr.mxu1 %v2292_v0  ;;  %1795 = vmatprep.subr.mxu0 %v2292_v0  ;;  %s1486_s8 = sshll.u32 %s2592_s20, 4  ;;  %s2646_s8 = int_to_ptr.vmem [resolvable:$true] %s1486_s8 }
  0x7d   : > { %1807 = vmatpush3.msra.mxu1 %v581_v7  ;;  %1796 = vmatpush3.msra.mxu0 %v496_v8 }
  0x7e   : > { %1809 = vmatmul.mubr.msk.f32.vlgmr.msra.gmra.mxu1 %vm507_vm1, %v495_v9  ;;  %1798 = vmatmul.mubr.msk.f32.vlgmr.msra.gmra.mxu0 %vm507_vm1, %v494_v10 }
  0x7f   : > { %1811 = vmatprep.subr.mxu1 %v2292_v0  ;;  %1813 = vmatprep.mubr.msk.f32.mxu1 %vm2293_vm0, %v2292_v0 }
  0x80   : > { %1821 = vmatprep.subr.mxu0 %v2292_v0  ;;  %1823 = vmatprep.mubr.msk.f32.mxu0 %vm2293_vm0, %v2292_v0 }
 0x13e   : > { %v661_v12 = vpop.f32.mrf.mxu1  ;;  %v577_v14 = vpop.f32.mrf.mxu0 }
 0x13f   : > { %v2563_v15 = vadd.f32 %v1724_v11, %v661_v12  ;;  %v578_v18 = vadd.f32 %v1722_v13, %v577_v14 }
 0x140   : > { %v1810_v16 = vpop.f32.mrf.mxu1  ;;  %v1799_v17 = vpop.f32.mrf.mxu0 }
 0x141   : > { %1011 = vrot.lane.b32.xlu1 %v2563_v15, %s2294_s13  ;;  %835 = vrot.lane.b32.xlu0 %v2563_v15, %s2295_s29  ;;  %v1365_v16 = vld [vmem:[#allocation11 + $0x18] sm:$0xff]  ;;  %v1364_v17 = vld [vmem:[#allocation11 + $0x10] sm:$0xff] }
 0x142   : > { %1812 = vmatpush3.xpose.msk.msra.mxu1 %vm665_vm2, %v2563_v15 }
 0x143   : > { %1816 = vmatprep.subr.mxu1 %v2292_v0 }
 0x145   : > { %1814 = vmatmul.mubr.msk.f32.vlgmr.msra.gmra.mxu1 %vm665_vm2, %v578_v18  ;;  %1009 = vrot.lane.b32.xlu1 %v578_v18, %s2294_s13  ;;  %s1503_s13 = sshll.u32 %s2617_s11, 4  ;;  %s2687_s13 = int_to_ptr.vmem [resolvable:$true] %s1503_s13 }
 0x146   : > { %833 = vrot.lane.b32.xlu0 %v578_v18, %s2295_s29  ;;  %1818 = vmatprep.mubr.msk.f32.mxu1 %vm2293_vm0, %v2292_v0  ;;  %s1756_s29 = sshll.u32 %s2275_s16, 9 }
 0x149   : > { %1185 = vrot.lane.b32.xlu1 %v578_v18, %s2296_s12  ;;  %v1363_v18 = vld [vmem:[#allocation11 + $0x8] sm:$0xff] }
 0x14a   : > { %1187 = vrot.lane.b32.xlu0 %v2563_v15, %s2296_s12 }
 0x1b3   : > { %v836_v19 = vpop.permute.xlu0 %835  ;;  %v1012_v20 = vpop.permute.xlu1 %1011 }
 0x1b4   : > { %1822 = vmatpush3.xpose.msk.msra.mxu0 %vm665_vm2, %v836_v19 }
 0x1b5   : > { %1831 = vmatprep.subr.mxu0 %v2292_v0 }
 0x1b7   : > { %v1010_v22 = vpop.permute.xlu1 %1009 }
 0x1b8   : > { %v834_v21 = vpop.permute.xlu0 %833 }
 0x1b9   : > { %1824 = vmatmul.mubr.msk.f32.vlgmr.msra.gmra.mxu0 %vm665_vm2, %v834_v21 }
 0x1ba   : > { %1832 = vmatpush3.xpose.msk.msra.mxu0 %vm665_vm2, %v1012_v20  ;;  %1833 = vmatprep.mubr.msk.f32.mxu0 %vm2293_vm0, %v2292_v0  ;;  %v1362_v20 = vld [vmem:[#allocation11] sm:$0xff] }
 0x1bb   : > { %1841 = vmatprep.subr.mxu0 %v2292_v0  ;;  %v1186_v24 = vpop.permute.xlu1 %1185 }
 0x1bc   : > { %v1188_v23 = vpop.permute.xlu0 %1187 }
 0x1bd   : > { %1834 = vmatmul.mubr.msk.f32.vlgmr.msra.gmra.mxu0 %vm665_vm2, %v1010_v22 }
 0x1be   : > { %1842 = vmatpush3.xpose.msk.msra.mxu0 %vm665_vm2, %v1188_v23  ;;  %1843 = vmatprep.mubr.msk.f32.mxu0 %vm2293_vm0, %v2292_v0 }
 0x1bf   : > { %1851 = vmatprep.subr.mxu0 %v2292_v0 }
 0x1c1   : > { %1844 = vmatmul.mubr.msk.f32.vlgmr.msra.gmra.mxu0 %vm665_vm2, %v1186_v24 }
 0x1c2   : > { %1859 = vmatprep.mubr.msk.f32.mxu0 %vm2293_vm0, %v2292_v0  ;;  %1852 = vmatpush3.msra.mxu0 %v1365_v16 }
 0x1c3   : > { %1853 = vmatprep.subr.mxu0 %v2292_v0 }
 0x1c4   : > { %1854 = vmatpush3.msra.mxu0 %v1364_v17 }
 0x1c5   : > { %1855 = vmatprep.subr.mxu0 %v2292_v0 }
 0x1c6   : > { %1856 = vmatpush3.msra.mxu0 %v1363_v18 }
 0x1c7   : > { %1857 = vmatprep.subr.mxu0 %v2292_v0 }
 0x1c8   : > { %1858 = vmatpush3.msra.mxu0 %v1362_v20 }
 0x205   : > { %v738_v25 = vpop.f32.mrf.mxu1 }
 0x206   : > { %v742_v26 = vmul.f32 0.35355338, %v738_v25 }
 0x207   : > { %v1815_v27 = vpop.f32.mrf.mxu1 }
 0x208   : > { %754 = vst.msk [vmem:[%s2592_s20] sm:$0xff] %vm665_vm2, %v742_v26  ;;  %v743_v28 = vsel %vm665_vm2, %v742_v26, -inf }
 0x209   : > { %744 = vmax.xlane.f32.xlu0 %v743_v28 }
 0x279   : > { %v907_v29 = vpop.f32.mrf.mxu0 }
 0x27a   : > { %v911_v30 = vmul.f32 0.35355338, %v907_v29 }
 0x27b   : > { %v1825_v31 = vpop.f32.mrf.mxu0 }
 0x27c   : > { %1731 = vst.msk [vmem:[%s2592_s20 + $0x8] sm:$0xff] %vm665_vm2, %v911_v30  ;;  %v912_v32 = vsel %vm665_vm2, %v911_v30, -inf }
 0x27d   : > { %913 = vmax.xlane.f32.xlu1 %v912_v32  ;;  %v1083_v33 = vpop.f32.mrf.mxu0 }
 0x27e   : > { %v1087_v34 = vmul.f32 0.35355338, %v1083_v33 }
 0x27f   : > { %v1835_v35 = vpop.f32.mrf.mxu0 }
 0x280   : > { %1736 = vst.msk [vmem:[%s2592_s20 + $0x10] sm:$0xff] %vm665_vm2, %v1087_v34  ;;  %v1088_v36 = vsel %vm665_vm2, %v1087_v34, -inf }
 0x281   : > { %1089 = vmax.xlane.f32.xlu0 %v1088_v36  ;;  %v1259_v37 = vpop.f32.mrf.mxu0 }
 0x282   : > { %v1263_v38 = vmul.f32 0.35355338, %v1259_v37 }
 0x283   : > { %v1845_v39 = vpop.f32.mrf.mxu0 }
 0x284   : > { %1741 = vst.msk [vmem:[%s2592_s20 + $0x18] sm:$0xff] %vm665_vm2, %v1263_v38  ;;  %v1264_v40 = vsel %vm665_vm2, %v1263_v38, -inf  ;;  %s2304_s20 = smov [#allocation13]  }
 0x285   : > { %1265 = vmax.xlane.f32.xlu0 %v1264_v40 }
 0x28e   : > { %756 = vrot.lane.b32.xlu1 %v2563_v15, %s2297_s0  ;;  %s2655_s0 = scalar_lea.hbm %s2776_s9, %s1756_s29 }
 0x292   : > { %v745_v41 = vpop.xlane.xlu0 %744 }
 0x293   : > { %v746_v42 = vsub.f32 %v742_v26, %v745_v41 }
 0x295   : > { %v747_v43 = vmul.f32 1.442695, %v746_v42 }
 0x297   : > { %1985 = vpow2.f32 %v747_v43 }
 0x2a4   : > { %v1986_v44 = vpop.eup %1985 }
 0x2a5   : > { %v749_v45 = vsel %vm665_vm2, %v1986_v44, 0.0 }
 0x2b2   : > { %750 = vadd.xlane.f32.xlu1 %v749_v45 }
 0x306   : > { %v914_v46 = vpop.xlane.xlu1 %913 }
 0x307   : > { %v915_v47 = vsub.f32 %v911_v30, %v914_v46 }
 0x309   : > { %v916_v48 = vmul.f32 1.442695, %v915_v47 }
 0x30a   : > { %v757_v49 = vpop.permute.xlu1 %756  ;;  %v1090_v50 = vpop.xlane.xlu0 %1089 }
 0x30b   : > { %1987 = vpow2.f32 %v916_v48  ;;  %v1091_v51 = vsub.f32 %v1087_v34, %v1090_v50  ;;  %1817 = vmatpush3.msra.mxu1 %v757_v49 }
 0x30c   : > { %1826 = vmatprep.subr.mxu1 %v2292_v0 }
 0x30d   : > { %v1092_v52 = vmul.f32 1.442695, %v1091_v51 }
 0x30e   : > { %v1266_v53 = vpop.xlane.xlu0 %1265 }
 0x30f   : > { %1989 = vpow2.f32 %v1092_v52  ;;  %v1267_v54 = vsub.f32 %v1263_v38, %v1266_v53 }
 0x311   : > { %v1268_v55 = vmul.f32 1.442695, %v1267_v54 }
 0x313   : > { %1991 = vpow2.f32 %v1268_v55 }
 0x318   : > { %v1988_v56 = vpop.eup %1987 }
 0x319   : > { %v918_v57 = vsel %vm665_vm2, %v1988_v56, 0.0 }
 0x31a   : > { %919 = vadd.xlane.f32.xlu0 %v918_v57 }
 0x31c   : > { %v1990_v58 = vpop.eup %1989 }
 0x31d   : > { %v1094_v59 = vsel %vm665_vm2, %v1990_v58, 0.0 }
 0x31e   : > { %1095 = vadd.xlane.f32.xlu1 %v1094_v59 }
 0x320   : > { %v1992_v60 = vpop.eup %1991 }
 0x321   : > { %v1270_v61 = vsel %vm665_vm2, %v1992_v60, 0.0 }
 0x322   : > { %1271 = vadd.xlane.f32.xlu0 %v1270_v61 }
 0x32f   : > { %1103 = vrot.lane.b32.xlu1 %v2563_v15, %s2298_s30  ;;  %s2659_s30 = scalar_lea.sflag [#allocation14], %s426_s6 }
 0x333   : > { %1279 = vrot.lane.b32.xlu1 %v2563_v15, %s2299_s27  ;;  %s2135_s27 = scalar_lea.vmem %s2646_s8, 512 }
 0x334   : > { %p2136_p0 = scmp.ne.s32.totalorder %s2646_s8, %s2135_s27 }
 0x336   : > { %p2137_p3 = pnand %p2136_p0, %p2461_p5 }
 0x338   : > { %927 = vrot.lane.b32.xlu0 %v2563_v15, %s2300_s23  ;;  %p2138_p10 = pneg %p2137_p3  ;;  %s2139_s23 = sshll.u32 %s2304_s20, 4  ;;  %s2140_s23 = int_to_ptr.vmem [resolvable:$false] %s2139_s23 }
 0x339   : > { %p2142_p11 = scmp.lt.s32.totalorder %s2646_s8, %s2140_s23 }
 0x33b   : > { %v751_v62 = vpop.xlane.xlu1 %750 }
 0x33c   : > { %1993 = vrcp.f32 %v751_v62 }
 0x349   : > { %v1994_v63 = vpop.eup %1993 }
 0x34a   : > { %v753_v1 = vmul.f32 %v1994_v63, %v1986_v44 }
 0x34c   : > { %755 = vst.msk [vmem:[%s2617_s11] sm:$0xff] %vm665_vm2, %v753_v1  ;;  %1819 = vmatmul.mubr.msk.f32.vlgmr.msra.gmra.mxu1 %vm665_vm2, %v753_v1 }
 0x34d   : > { %1828 = vmatprep.mubr.msk.f32.mxu1 %vm2293_vm0, %v2292_v0 }
 0x3a3   : > { %v920_v2 = vpop.xlane.xlu0 %919 }
 0x3a4   : > { %1995 = vrcp.f32 %v920_v2 }
 0x3a7   : > { %v1096_v3 = vpop.xlane.xlu1 %1095 }
 0x3a8   : > { %1997 = vrcp.f32 %v1096_v3 }
 0x3ab   : > { %v1272_v4 = vpop.xlane.xlu0 %1271  ;;  %v1104_v7 = vpop.permute.xlu1 %1103 }
 0x3ac   : > { %1999 = vrcp.f32 %v1272_v4 }
 0x3af   : > { %v928_v5 = vpop.permute.xlu0 %927  ;;  %v1280_v11 = vpop.permute.xlu1 %1279 }
 0x3b0   : > { %1827 = vmatpush3.msra.mxu1 %v928_v5 }
 0x3b1   : > { %v1996_v6 = vpop.eup %1995  ;;  %1836 = vmatprep.subr.mxu1 %v2292_v0 }
 0x3b2   : > { %v922_v8 = vmul.f32 %v1996_v6, %v1988_v56 }
 0x3b4   : > { %1732 = vst.msk [vmem:[%s2617_s11 + $0x8] sm:$0xff] %vm665_vm2, %v922_v8  ;;  %1829 = vmatmul.mubr.msk.f32.vlgmr.msra.gmra.mxu1 %vm665_vm2, %v922_v8 }
 0x3b5   : > { %v1998_v9 = vpop.eup %1997  ;;  %1837 = vmatpush3.msra.mxu1 %v1104_v7  ;;  %1838 = vmatprep.mubr.msk.f32.mxu1 %vm2293_vm0, %v2292_v0 }
 0x3b6   : > { %1846 = vmatprep.subr.mxu1 %v2292_v0  ;;  %v1098_v10 = vmul.f32 %v1998_v9, %v1990_v58 }
 0x3b8   : > { %1737 = vst.msk [vmem:[%s2617_s11 + $0x10] sm:$0xff] %vm665_vm2, %v1098_v10  ;;  %1839 = vmatmul.mubr.msk.f32.vlgmr.msra.gmra.mxu1 %vm665_vm2, %v1098_v10 }
 0x3b9   : > { %v2000_v12 = vpop.eup %1999  ;;  %1847 = vmatpush3.msra.mxu1 %v1280_v11  ;;  %1848 = vmatprep.mubr.msk.f32.mxu1 %vm2293_vm0, %v2292_v0 }
 0x3ba   : > { %v1274_v13 = vmul.f32 %v2000_v12, %v1992_v60 }
 0x3bc   : > { %1742 = vst.msk [vmem:[%s2617_s11 + $0x18] sm:$0xff] %vm665_vm2, %v1274_v13  ;;  %1849 = vmatmul.mubr.msk.f32.vlgmr.msra.gmra.mxu1 %vm665_vm2, %v1274_v13 }
 0x40c   : > { %v828_v14 = vpop.f32.mrf.mxu1 }
 0x40d   : > { %832 = vst.msk [vmem:[#allocation2] sm:$0xff] %vm665_vm2, %v828_v14 }
 0x40e   : > { %v1820_v15 = vpop.f32.mrf.mxu1 }
 0x474   : > { %v999_v19 = vpop.f32.mrf.mxu1 }
 0x475   : > { %1004 = vrot.lane.b32.xlu0 %v999_v19, %s2301_s21 }
 0x476   : > { %v1830_v21 = vpop.f32.mrf.mxu1 }
 0x478   : > { %v1175_v22 = vpop.f32.mrf.mxu1 }
 0x479   : > { %1180 = vrot.lane.b32.xlu1 %v1175_v22, %s2302_s22  ;;  %s2141_s22 = scalar_lea.vmem %s2140_s23, 1024 }
 0x47a   : > { %v1840_v23 = vpop.f32.mrf.mxu1  ;;  %p2143_p9 = scmp.lt.s32.totalorder %s2141_s22, %s2135_s27 }
 0x47c   : > { %v1351_v24 = vpop.f32.mrf.mxu1  ;;  %p2144_p13 = por %p2143_p9, %p2142_p11 }
 0x47d   : > { %1356 = vrot.lane.b32.xlu0 %v1351_v24, %s2303_s25 }
 0x47e   : > { %v1850_v25 = vpop.f32.mrf.mxu1  ;;  %p2145_p2 = pnand %p2144_p13, %p2138_p10 }
 0x4e7   : > { %v1005_v26 = vpop.permute.xlu0 %1004 }
 0x4e8   : > { %1008 = vst.msk [vmem:[#allocation2] sm:$0xff] %vm1007_vm3, %v1005_v26 }
 0x4eb   : > { %v1181_v0 = vpop.permute.xlu1 %1180 }
 0x4ec   : > { %1184 = vst.msk [vmem:[#allocation2] sm:$0xff] %vm1183_vm4, %v1181_v0 }
 0x4ef   : > { %v1357_v27 = vpop.permute.xlu0 %1356 }
 0x4f0   : > { %1360 = vst.msk [vmem:[#allocation2] sm:$0xff] %vm1359_vm5, %v1357_v27 }
 0x4f7   : > { %v1361_v28 = vld [vmem:[#allocation2] sm:$0xff] }
 0x4f8   : > { %1860 = vmatmul.mubr.msk.f32.vlgmr.msra.gmra.mxu0 %vm507_vm1, %v1361_v28 }
 0x4f9   : > { %2148 = shalt.err (!%p2145_p2)
}
 0x4fa   : > { %s2149_s19 = scalar_lea.hbm %s2655_s0, 512  ;;  %s2153_s12 = scalar_lea.hbm %s2776_s9, 1024 }
 0x4fb   : > { %p2150_p4 = scmp.ne.s32.totalorder %s2655_s0, %s2149_s19  ;;  %p2154_p7 = scmp.lt.s32.totalorder %s2655_s0, %s2776_s9 }
 0x4fc   : > { %p2155_p6 = scmp.lt.s32.totalorder %s2153_s12, %s2149_s19 }
 0x4fd   : > { %p2151_p1 = pnand %p2150_p4, %p2461_p5 }
 0x4fe   : > { %p2156_p12 = por %p2155_p6, %p2154_p7 }
 0x4ff   : > { %p2152_p8 = pneg %p2151_p1 }
 0x501   : > { %p2157_p0 = pnand %p2156_p12, %p2152_p8 }
 0x503   : > { %2160 = shalt.err (!%p2157_p0)
}
 0x504   : > { %s2305_s27 = smov 128   ;;  %s1502_s19 = scalar_lea.hbm %s2777_s10, %s1756_s29 }
 0x505   : > { %1879 = dma.vmem_to_hbm [thread:$0]  (%p2461_p5), %s2646_s8, 512, %s2655_s0, %s2659_s30, %s2305_s27, %s2305_s27, %s2301_s21  }
 0x506   : > { %s2161_s6 = scalar_lea.vmem %s2687_s13, 512  ;;  %s2306_s25 = smov [#allocation15]  }
 0x507   : > { %p2162_p3 = scmp.ne.s32.totalorder %s2687_s13, %s2161_s6  ;;  %s2165_s12 = sshll.u32 %s2306_s25, 4  ;;  %s2166_s12 = int_to_ptr.vmem [resolvable:$false] %s2165_s12 }
 0x508   : > { %s2167_s8 = scalar_lea.vmem %s2166_s12, 1024  ;;  %p2168_p9 = scmp.lt.s32.totalorder %s2687_s13, %s2166_s12 }
 0x509   : > { %p2163_p10 = pnand %p2162_p3, %p2461_p5  ;;  %p2169_p13 = scmp.lt.s32.totalorder %s2167_s8, %s2161_s6 }
 0x50b   : > { %p2164_p11 = pneg %p2163_p10  ;;  %p2170_p2 = por %p2169_p13, %p2168_p9 }
 0x50d   : > { %p2171_p4 = pnand %p2170_p2, %p2164_p11 }
 0x50f   : > { %2174 = shalt.err (!%p2171_p4)
}
 0x510   : > { %s2175_s11 = scalar_lea.hbm %s1502_s19, 512  ;;  %s2179_s2 = scalar_lea.hbm %s2777_s10, 1024 }
 0x511   : > { %p2176_p1 = scmp.ne.s32.totalorder %s1502_s19, %s2175_s11  ;;  %p2180_p6 = scmp.lt.s32.totalorder %s1502_s19, %s2777_s10 }
 0x512   : > { %p2181_p12 = scmp.lt.s32.totalorder %s2179_s2, %s2175_s11 }
 0x513   : > { %p2177_p8 = pnand %p2176_p1, %p2461_p5 }
 0x514   : > { %p2182_p0 = por %p2181_p12, %p2180_p6 }
 0x515   : > { %p2178_p7 = pneg %p2177_p8 }
 0x517   : > { %p2183_p3 = pnand %p2182_p0, %p2178_p7 }
 0x519   : > { %2186 = shalt.err (!%p2183_p3)
}
 0x51a   : > { %1880 = dma.vmem_to_hbm [thread:$0]  (%p2461_p5), %s2687_s13, 512, %s1502_s19, %s2659_s30, %s2305_s27, %s2305_s27, %s2301_s21  }
 0x51b   : > { %v1744_v29 = vld [vmem:[%s2774_s7] ss:$0 sm:$0xff]  ;;  %s1749_s25 = sshll.u32 %s2275_s16, 7  ;;  %s479_s12 = scalar_lea.vmem [#allocation12], %s2509_s28 }
 0x51c   : > { %s1472_s8 = sshll.u32 %s479_s12, 4  ;;  %s2809_s0 = sld [smem:[#allocation29_spill]]  ;;  %s1473_s8 = int_to_ptr.vmem [resolvable:$true] %s1472_s8 }
 0x51d   : > { %s1448_s20 = scalar_lea.sflag [#allocation5], %s2506_s4  ;;  %s2187_s21 = scalar_lea.vmem %s1473_s8, 128 }
 0x51e   : > { %p2188_p10 = scmp.ne.s32.totalorder %s1473_s8, %s2187_s21  ;;  %s2307_s16 = smov [#allocation12]  }
 0x51f   : > { %s2191_s28 = sshll.u32 %s2307_s16, 4  ;;  %s2192_s28 = int_to_ptr.vmem [resolvable:$false] %s2191_s28 }
 0x520   : > { %p2189_p11 = pnand %p2188_p10, %p2461_p5  ;;  %s2193_s13 = scalar_lea.vmem %s2192_s28, 256 }
 0x521   : > { %p2194_p13 = scmp.lt.s32.totalorder %s1473_s8, %s2192_s28  ;;  %p2195_p2 = scmp.lt.s32.totalorder %s2193_s13, %s2187_s21 }
 0x522   : > { %s2722_s2 = scalar_lea.hbm %s2809_s0, %s1749_s25  ;;  %p2190_p9 = pneg %p2189_p11 }
 0x523   : > { %p2196_p4 = por %p2195_p2, %p2194_p13 }
 0x525   : > { %p2197_p1 = pnand %p2196_p4, %p2190_p9 }
 0x5b8   : > { %v1442_v30 = vpop.f32.mrf.mxu0 }
 0x5b9   : > { %v1443_v31 = vadd.f32 %v1744_v29, %v1442_v30 }
 0x5ba   : > { %v1861_v32 = vpop.f32.mrf.mxu0 }
 0x5bb   : > { %1446 = vst.msk [vmem:[%s479_s12] sm:$0xff] %vm507_vm1, %v1443_v31 }
 0x5bc   : > { %2200 = shalt.err (!%p2197_p1)
}
 0x5bd   : > { %s2201_s30 = scalar_lea.hbm %s2722_s2, 128  ;;  %s2205_s19 = scalar_lea.hbm %s2809_s0, 256 }
 0x5be   : > { %p2202_p8 = scmp.ne.s32.totalorder %s2722_s2, %s2201_s30  ;;  %p2206_p12 = scmp.lt.s32.totalorder %s2722_s2, %s2809_s0 }
 0x5bf   : > { %p2207_p0 = scmp.lt.s32.totalorder %s2205_s19, %s2201_s30 }
 0x5c0   : > { %p2203_p7 = pnand %p2202_p8, %p2461_p5 }
 0x5c1   : > { %p2208_p3 = por %p2207_p0, %p2206_p12 }
 0x5c2   : > { %p2204_p6 = pneg %p2203_p7 }
 0x5c4   : > { %p2209_p10 = pnand %p2208_p3, %p2204_p6 }
 0x5c6   : > { %2212 = shalt.err (!%p2209_p10)
}
 0x5c7   : > { %1878 = dma.vmem_to_hbm [thread:$0]  (%p2461_p5), %s1473_s8, 128, %s2722_s2, %s1448_s20  }
 0x5c8 PF: > { %s2810_s6 = sld [smem:[#allocation22_spill]]  ;;  %p2813_p9 = scmp.ge.s32.totalorder %s2283_s18, 2 }
 0x5c9   : > { %s2811_s25 = sld [smem:[#allocation23_spill]] }
 0x5ce   : > { %s1518_s12 = sand.u32 1, %s2810_s6  }
 0x5cf   : > { %p2812_p11 = scmp.ne.s32.totalorder %s2811_s25, 0  ;;  %s1519_s11 = scalar_lea.sflag [#allocation5], %s1518_s12 }
 0x5d1   : > { %p1902_p13 = pnand %p2813_p9, %p2812_p11 }
 0x5d3   : > { %p1903_p2 = pneg %p1902_p13 }
 0x5d5   : > { %2254 = dma.done.wait (%p1903_p2), %s1519_s11, 128  }
 0x5d6   : > { %2256 = vsyncadd (%p1903_p2), %s1519_s11, 4294967168  ;;  %s2814_s29 = sadd.s32 4294967294, %s2283_s18  }
 0x5d7   : > { %s1527_s21 = sand.u32 1, %s2814_s29  }
 0x5d8   : > { %s1528_s16 = scalar_lea.sflag [#allocation14], %s1527_s21 }
 0x5d9   : > { %2258 = dma.done.wait (%p1903_p2), %s1528_s16, 1024  }
 0x5da   : > { %2260 = vsyncadd (%p1903_p2), %s1528_s16, 4294966272  ;;  %s34_s18 = sadd.s32 1, %s2283_s18   ;;  %s2815_s26 = sld [smem:[#allocation24_spill]] }
 0x5db   : > { %p31_p5 = scmp.ge.s32.totalorder %s34_s18, 4   ;;  %s2816_s13 = smov %s2267_s14 }
 0x5dc   : > { %s2817_s14 = smov %s2271_s15  ;;  %s2818_s15 = smov %s2473_s24 }
 0x5dd   : > { %s2819_s16 = smov %s2279_s17  ;;  %33 = sbr.rel (!%p31_p5) target bundleno = 17 (0x11), region = 160 }
 0x5e0   : > { %s2820_s17 = smov %s2815_s26 }
 0x5e2   :  { %1542 = vsyncpa [#allocation4], 1 }
 0x5e3   :  { %1544 = vsyncpa [#allocation4 + $0x1], 1 }
 0x5e4   :  { %1545 = vsyncpa [#allocation7], 1 }
 0x5e5   :  { %1547 = vsyncpa [#allocation7 + $0x1], 1 }
 0x5e6   :  { %1548 = vsyncpa [#allocation10], 1 }
 0x5e7   :  { %1549 = vsyncpa [#allocation5], 1 }
 0x5e8   :  { %1551 = vsyncpa [#allocation5 + $0x1], 1 }
 0x5e9   :  { %1552 = vsyncpa [#allocation14], 1 }
 0x5ea   :  { %1554 = vsyncpa [#allocation14 + $0x1], 1 }

</bundles_post_ra>
